<compile_context>
chip_gen: v6e
topology: v6e:2x2x1
jax: 0.10.0
libtpu: 0.0.40
codegen_flags: <defaults>
</compile_context>

<pallas_src>
import functools

import jax
import jax.numpy as jnp
from jax.experimental import pallas as pl
from jax.experimental.pallas import tpu as pltpu

PAD = 128               # lane-padded feature width of every layer
SINGLE_BLOCK_MAX = 512  # batches up to this size run as one block (grid = 1)


def _round_up(x, m):
    return ((x + m - 1) // m) * m


def _dqn_kernel(x_ref, w_ref, b_ref, o_ref):
    """Fused 4-layer MLP: relu(xW1+b1) -> relu(.W2+b2) -> relu(.W3+b3) -> .W4+b4.

    w_ref: (4, 128, 128) bf16 stacked weights, b_ref: (4, 1, 128) f32 stacked
    biases.  bf16 operands, f32 MXU accumulation, f32 bias/ReLU.
    """
    h = x_ref[...]                                                   # (TB, 128) bf16
    for l in range(3):
        a = jnp.dot(h, w_ref[l], preferred_element_type=jnp.float32) + b_ref[l]
        h = jnp.maximum(a, 0.0).astype(jnp.bfloat16)
    o = jnp.dot(h, w_ref[3], preferred_element_type=jnp.float32) + b_ref[3]
    o_ref[...] = o.astype(o_ref.dtype)


@functools.partial(jax.jit, static_argnames=("action_size",))
def traffic_light_dqn_forward(traffic_state, prev_action, time, params,
                              action_size):
    """JAX wrapper: fused concat + lane-pad + bf16 cast (glue), Pallas MLP."""
    w_stack, b_stack = params
    x = jnp.concatenate([traffic_state, prev_action, time], axis=1)
    B, F = x.shape

    # Lane pad only (no batch pad).  Rows >= B in the last block are garbage,
    # are never reduced across, and their output stores are masked.
    x_pad = jnp.pad(x.astype(jnp.bfloat16), ((0, 0), (0, PAD - F)))

    # Batch tiling: one block for small/medium batches; 512/1024-row tiles for
    # big batches (keeps >= 2 "parallel" grid steps -> v7x megacore sharding).
    if B <= SINGLE_BLOCK_MAX:
        TB = max(16, _round_up(B, 16))       # bf16 sublane granule = 16 rows
    elif B <= 2048:
        TB = 512
    else:
        TB = 1024
    grid_len = pl.cdiv(B, TB)

    rows = grid_len * TB
    flops = 4 * 2 * rows * PAD * PAD
    bytes_accessed = (rows * PAD * 2          # x  (bf16 in)
                      + 4 * PAD * PAD * 2     # stacked weights (bf16)
                      + 4 * PAD * 4           # stacked biases (f32)
                      + rows * PAD * 2)       # out (bf16)

    out = pl.pallas_call(
        _dqn_kernel,
        out_shape=jax.ShapeDtypeStruct((B, PAD), jnp.bfloat16),
        grid_spec=pltpu.PrefetchScalarGridSpec(
            num_scalar_prefetch=0,
            grid=(grid_len,),
            in_specs=[
                pl.BlockSpec((TB, PAD), lambda i: (i, 0)),          # x tile
                pl.BlockSpec((4, PAD, PAD), lambda i: (0, 0, 0)),   # stacked W
                pl.BlockSpec((4, 1, PAD), lambda i: (0, 0, 0)),     # stacked b
            ],
            out_specs=pl.BlockSpec((TB, PAD), lambda i: (i, 0)),
        ),
        compiler_params=pltpu.CompilerParams(
            dimension_semantics=("parallel",)),
        cost_estimate=pl.CostEstimate(
            flops=flops, transcendentals=0, bytes_accessed=bytes_accessed),
    )(x_pad, w_stack, b_stack)

    return out[:, :action_size]


def init_params(key, state_size, action_size):
    """PyTorch-style init (uniform +/- 1/sqrt(fan_in)), stacked + padded.

    Returns (w_stack: bf16 (4, PAD, PAD), b_stack: f32 (4, 1, PAD)); padded
    rows/cols are zero so padding never changes the real outputs.
    """
    dims = [state_size + action_size + 1, 128, 64, 32, action_size]
    w_stack = jnp.zeros((4, PAD, PAD), jnp.float32)
    b_stack = jnp.zeros((4, 1, PAD), jnp.float32)
    for li in range(4):
        fan_in, fan_out = dims[li], dims[li + 1]
        key, kw, kb = jax.random.split(key, 3)
        bound = 1.0 / jnp.sqrt(jnp.float32(fan_in))
        w = jax.random.uniform(kw, (fan_in, fan_out), jnp.float32, -bound, bound)
        b = jax.random.uniform(kb, (fan_out,), jnp.float32, -bound, bound)
        w_stack = w_stack.at[li, :fan_in, :fan_out].set(w)
        b_stack = b_stack.at[li, 0, :fan_out].set(b)
    return w_stack.astype(jnp.bfloat16), b_stack


def _reference_forward_bf16(traffic_state, prev_action, time, params,
                            action_size):
    """Pure-JAX reference mirroring the kernel math exactly
    (bf16 operands, f32 accumulate, f32 bias/ReLU, bf16 output)."""
    w_stack, b_stack = params
    x = jnp.concatenate([traffic_state, prev_action, time], axis=1)
    F = x.shape[1]
    h = jnp.pad(x.astype(jnp.bfloat16), ((0, 0), (0, PAD - F)))
    out = None
    for l in range(4):
        acc = jnp.dot(h, w_stack[l], preferred_element_type=jnp.float32) + b_stack[l]
        if l < 3:
            h = jnp.maximum(acc, 0.0).astype(jnp.bfloat16)
        else:
            out = acc.astype(jnp.bfloat16)
    return out[:, :action_size]


def _reference_forward_f32(traffic_state, prev_action, time, params,
                           action_size):
    """Pure-f32 reference of the module's math (loose-tolerance sanity check)."""
    w_stack, b_stack = params
    x = jnp.concatenate([traffic_state, prev_action, time], axis=1)
    dims = [x.shape[1], 128, 64, 32, action_size]
    h = x.astype(jnp.float32)
    for l in range(4):
        fan_in, fan_out = dims[l], dims[l + 1]
        h = h @ w_stack[l, :fan_in, :fan_out].astype(jnp.float32) + b_stack[l, 0, :fan_out]
        if l < 3:
            h = jnp.maximum(h, 0.0)
    return h


if __name__ == "__main__":
    state_size = 16
    action_size = 4
    batch = 2

    root = jax.random.PRNGKey(0)
    kin, kparams = jax.random.split(root)
    k1, k2, k3 = jax.random.split(kin, 3)
    traffic_state = jax.random.normal(k1, (batch, state_size), jnp.float32)
    prev_action = jax.random.normal(k2, (batch, action_size), jnp.float32)
    time = jax.random.uniform(k3, (batch, 1), jnp.float32)

    params = init_params(kparams, state_size, action_size)

    out = traffic_light_dqn_forward(traffic_state, prev_action, time, params,
                                    action_size)
    out = jax.block_until_ready(out)

    ref_bf16 = _reference_forward_bf16(traffic_state, prev_action, time,
                                       params, action_size)
    ref_f32 = _reference_forward_f32(traffic_state, prev_action, time,
                                     params, action_size)

    out_f32 = out.astype(jnp.float32)
    assert out.shape == (batch, action_size)
    assert jnp.allclose(out_f32, ref_bf16.astype(jnp.float32),
                        atol=5e-3, rtol=5e-3), "mismatch vs bf16-mirrored reference"
    assert jnp.allclose(out_f32, ref_f32, atol=5e-2, rtol=5e-2), \
        "mismatch vs f32 reference"

    print("KERNEL_OK")
</pallas_src>

<mosaic_0001>
module attributes {stable_mosaic.version = 11 : i64} {
  func.func @_dqn_kernel(%arg0: i32, %arg1: memref<16x128xbf16, #tpu.memory_space<vmem>>, %arg2: memref<4x128x128xbf16, #tpu.memory_space<vmem>>, %arg3: memref<4x1x128xf32, #tpu.memory_space<vmem>>, %arg4: memref<16x128xbf16, #tpu.memory_space<vmem>>) attributes {dimension_semantics = [#tpu.dimension_semantics<parallel>], iteration_bounds = array<i64: 1>, scalar_prefetch = 0 : i64, scratch_operands = 0 : i64, tpu.core_type = #tpu.core_type<tc>, window_params = [{transform_indices = @transform_0, window_bounds = array<i64: 16, 128>}, {pipeline_mode = #tpu.pipeline_mode<synchronous>, transform_indices = @transform_1, window_bounds = array<i64: 4, 128, 128>}, {pipeline_mode = #tpu.pipeline_mode<synchronous>, transform_indices = @transform_2, window_bounds = array<i64: 4, 1, 128>}, {transform_indices = @transform_3, window_bounds = array<i64: 16, 128>}]} {
    %c0 = arith.constant 0 : index
    %c0_0 = arith.constant 0 : index
    %0 = vector.load %arg1[%c0, %c0_0] : memref<16x128xbf16, #tpu.memory_space<vmem>>, vector<16x128xbf16>
    %c0_1 = arith.constant 0 : index
    %c0_2 = arith.constant 0 : index
    %c0_3 = arith.constant 0 : index
    %1 = vector.load %arg2[%c0_1, %c0_2, %c0_3] : memref<4x128x128xbf16, #tpu.memory_space<vmem>>, vector<1x128x128xbf16>
    %2 = vector.shape_cast %1 : vector<1x128x128xbf16> to vector<128x128xbf16>
    %cst = arith.constant dense<0.000000e+00> : vector<16x128xf32>
    %3 = tpu.matmul %0, %2, %cst {dimension_numbers = #tpu.dot_dimension_numbers<[1], [0], [0], [1], [0, 0, 1, 1], [], []>} : vector<16x128xbf16>, vector<128x128xbf16>, vector<16x128xf32> -> vector<16x128xf32>
    %c0_4 = arith.constant 0 : index
    %c0_5 = arith.constant 0 : index
    %c0_6 = arith.constant 0 : index
    %4 = vector.load %arg3[%c0_4, %c0_5, %c0_6] : memref<4x1x128xf32, #tpu.memory_space<vmem>>, vector<1x1x128xf32>
    %5 = vector.shape_cast %4 : vector<1x1x128xf32> to vector<1x128xf32>
    %6 = vector.broadcast %5 : vector<1x128xf32> to vector<16x128xf32>
    %7 = arith.addf %3, %6 : vector<16x128xf32>
    %cst_7 = arith.constant 0.000000e+00 : f32
    %8 = vector.broadcast %cst_7 : f32 to vector<16x128xf32>
    %9 = arith.maximumf %7, %8 : vector<16x128xf32>
    %10 = arith.truncf %9 : vector<16x128xf32> to vector<16x128xbf16>
    %c1 = arith.constant 1 : index
    %c0_8 = arith.constant 0 : index
    %c0_9 = arith.constant 0 : index
    %11 = vector.load %arg2[%c1, %c0_8, %c0_9] : memref<4x128x128xbf16, #tpu.memory_space<vmem>>, vector<1x128x128xbf16>
    %12 = vector.shape_cast %11 : vector<1x128x128xbf16> to vector<128x128xbf16>
    %cst_10 = arith.constant dense<0.000000e+00> : vector<16x128xf32>
    %13 = tpu.matmul %10, %12, %cst_10 {dimension_numbers = #tpu.dot_dimension_numbers<[1], [0], [0], [1], [0, 0, 1, 1], [], []>} : vector<16x128xbf16>, vector<128x128xbf16>, vector<16x128xf32> -> vector<16x128xf32>
    %c1_11 = arith.constant 1 : index
    %c0_12 = arith.constant 0 : index
    %c0_13 = arith.constant 0 : index
    %14 = vector.load %arg3[%c1_11, %c0_12, %c0_13] : memref<4x1x128xf32, #tpu.memory_space<vmem>>, vector<1x1x128xf32>
    %15 = vector.shape_cast %14 : vector<1x1x128xf32> to vector<1x128xf32>
    %16 = vector.broadcast %15 : vector<1x128xf32> to vector<16x128xf32>
    %17 = arith.addf %13, %16 : vector<16x128xf32>
    %cst_14 = arith.constant 0.000000e+00 : f32
    %18 = vector.broadcast %cst_14 : f32 to vector<16x128xf32>
    %19 = arith.maximumf %17, %18 : vector<16x128xf32>
    %20 = arith.truncf %19 : vector<16x128xf32> to vector<16x128xbf16>
    %c2 = arith.constant 2 : index
    %c0_15 = arith.constant 0 : index
    %c0_16 = arith.constant 0 : index
    %21 = vector.load %arg2[%c2, %c0_15, %c0_16] : memref<4x128x128xbf16, #tpu.memory_space<vmem>>, vector<1x128x128xbf16>
    %22 = vector.shape_cast %21 : vector<1x128x128xbf16> to vector<128x128xbf16>
    %cst_17 = arith.constant dense<0.000000e+00> : vector<16x128xf32>
    %23 = tpu.matmul %20, %22, %cst_17 {dimension_numbers = #tpu.dot_dimension_numbers<[1], [0], [0], [1], [0, 0, 1, 1], [], []>} : vector<16x128xbf16>, vector<128x128xbf16>, vector<16x128xf32> -> vector<16x128xf32>
    %c2_18 = arith.constant 2 : index
    %c0_19 = arith.constant 0 : index
    %c0_20 = arith.constant 0 : index
    %24 = vector.load %arg3[%c2_18, %c0_19, %c0_20] : memref<4x1x128xf32, #tpu.memory_space<vmem>>, vector<1x1x128xf32>
    %25 = vector.shape_cast %24 : vector<1x1x128xf32> to vector<1x128xf32>
    %26 = vector.broadcast %25 : vector<1x128xf32> to vector<16x128xf32>
    %27 = arith.addf %23, %26 : vector<16x128xf32>
    %cst_21 = arith.constant 0.000000e+00 : f32
    %28 = vector.broadcast %cst_21 : f32 to vector<16x128xf32>
    %29 = arith.maximumf %27, %28 : vector<16x128xf32>
    %30 = arith.truncf %29 : vector<16x128xf32> to vector<16x128xbf16>
    %c3 = arith.constant 3 : index
    %c0_22 = arith.constant 0 : index
    %c0_23 = arith.constant 0 : index
    %31 = vector.load %arg2[%c3, %c0_22, %c0_23] : memref<4x128x128xbf16, #tpu.memory_space<vmem>>, vector<1x128x128xbf16>
    %32 = vector.shape_cast %31 : vector<1x128x128xbf16> to vector<128x128xbf16>
    %cst_24 = arith.constant dense<0.000000e+00> : vector<16x128xf32>
    %33 = tpu.matmul %30, %32, %cst_24 {dimension_numbers = #tpu.dot_dimension_numbers<[1], [0], [0], [1], [0, 0, 1, 1], [], []>} : vector<16x128xbf16>, vector<128x128xbf16>, vector<16x128xf32> -> vector<16x128xf32>
    %c3_25 = arith.constant 3 : index
    %c0_26 = arith.constant 0 : index
    %c0_27 = arith.constant 0 : index
    %34 = vector.load %arg3[%c3_25, %c0_26, %c0_27] : memref<4x1x128xf32, #tpu.memory_space<vmem>>, vector<1x1x128xf32>
    %35 = vector.shape_cast %34 : vector<1x1x128xf32> to vector<1x128xf32>
    %36 = vector.broadcast %35 : vector<1x128xf32> to vector<16x128xf32>
    %37 = arith.addf %33, %36 : vector<16x128xf32>
    %38 = arith.truncf %37 : vector<16x128xf32> to vector<16x128xbf16>
    %c0_28 = arith.constant 0 : index
    %c0_29 = arith.constant 0 : index
    %39 = vector.load %arg4[%c0_28, %c0_29] : memref<16x128xbf16, #tpu.memory_space<vmem>>, vector<16x128xbf16>
    tpu.vector_store %arg4[%c0_28, %c0_29], %38 {strides = array<i32>} : memref<16x128xbf16, #tpu.memory_space<vmem>>, vector<16x128xbf16>,
    return
  }
  func.func @transform_0(%arg0: i32) -> (i32, i32) {
    %c0_i32 = arith.constant 0 : i32
    %c0_i32_0 = arith.constant 0 : i32
    return %arg0, %c0_i32 : i32, i32
  }
  func.func @transform_1(%arg0: i32) -> (i32, i32, i32) {
    %c0_i32 = arith.constant 0 : i32
    %c0_i32_0 = arith.constant 0 : i32
    %c0_i32_1 = arith.constant 0 : i32
    %c0_i32_2 = arith.constant 0 : i32
    return %c0_i32, %c0_i32_0, %c0_i32_1 : i32, i32, i32
  }
  func.func @transform_2(%arg0: i32) -> (i32, i32, i32) {
    %c0_i32 = arith.constant 0 : i32
    %c0_i32_0 = arith.constant 0 : i32
    %c0_i32_1 = arith.constant 0 : i32
    %c0_i32_2 = arith.constant 0 : i32
    return %c0_i32, %c0_i32_0, %c0_i32_1 : i32, i32, i32
  }
  func.func @transform_3(%arg0: i32) -> (i32, i32) {
    %c0_i32 = arith.constant 0 : i32
    %c0_i32_0 = arith.constant 0 : i32
    return %arg0, %c0_i32 : i32, i32
  }
}

</mosaic_0001>

<bundles_post_ra>
// kernel: traffic_light_dqn_forward.1
= control target key start
LH: loop header
LB: loop body
LE: loop exit
PB: predicated region body
PF: predicated region fallthrough
CT: control target
= control target key end

     0   :  { %8 = vsyncpa [#allocation3], 0  ;;  %s1013_s0 = inlined_call_operand.vmem [shape: bf16[2,128], index: 0, kind: input, shape index: {}]   ;;  %s1014_s1 = inlined_call_operand.hbm [shape: bf16[4,128,128], index: 1, kind: input, shape index: {}]   ;;  %s1015_s2 = inlined_call_operand.vmem [shape: f32[4,1,128], index: 2, kind: input, shape index: {}]   ;;  %s1016_s3 = inlined_call_operand.hbm [shape: bf16[2,128], index: 3, kind: output, shape index: {}]  }
   0x1   :  { %9 = vsyncpa [#allocation4], 0  ;;  %s888_s12 = smov [#allocation2]  }
   0x2   :  { %s17_s13 = sshll.u32 %s888_s12, 4  ;;  %s18_s13 = int_to_ptr.vmem [resolvable:$true] %s17_s13 }
   0x3   :  { %s852_s14 = scalar_lea.vmem %s18_s13, 4096  ;;  %p857_p1 = scmp.lt.s32.totalorder %s18_s13, %s18_s13 }
   0x4   :  { %p853_p0 = scmp.ne.s32.totalorder %s18_s13, %s852_s14  ;;  %p858_p2 = scmp.lt.s32.totalorder %s852_s14, %s852_s14 }
   0x6   :  { %p859_p3 = por %p858_p2, %p857_p1 }
   0x8   :  { %p860_p4 = pnand %p859_p3, %p853_p0 }
   0xa   :  { %863 = shalt.err (!%p860_p4)
}
   0xb   :  { %s889_s15 = smov 64   ;;  %s890_s16 = smov 4  }
   0xc   :  { %23 = dma.hbm_to_vmem [thread:$0]  %s1014_s1, 4096, %s18_s13, [#allocation3], %s889_s15, %s889_s15, %s890_s16  }
   0xd   :  { %884 = dma.done.wait [#allocation3], 4096  }
   0xe   :  { %885 = vsyncadd [#allocation3], 4294963200  ;;  %v891_v0 = vmov 0.0   ;;  %vm892_vm0 = vmmov 0   ;;  %v812_v1 = vld [vmem:[#allocation2 + $0x38] sm:$0xff]   ;;  %v813_v2 = vld [vmem:[#allocation2 + $0x30] sm:$0xff]   ;;  %v76_v3 = vlaneseq }
   0xf   :  { %723 = vmatprep.subr.bf16.mxu0 %v891_v0  ;;  %739 = vmatprep.mubr.msk.bf16.mxu0 %vm892_vm0, %v891_v0  ;;  %v893_v4 = vmov 1966171168   ;;  %v814_v6 = vld [vmem:[#allocation2 + $0x28] sm:$0xff]   ;;  %v815_v8 = vld [vmem:[#allocation2 + $0x20] sm:$0xff]   ;;  %v820_v18 = vld [vmem:[#allocation2 + $0x78] sm:$0xff]  }
  0x10   :  { %743 = vmatprep.subr.bf16.mxu1 %v891_v0  ;;  %759 = vmatprep.mubr.msk.bf16.mxu1 %vm892_vm0, %v891_v0  ;;  %v74_v5 = vunpack.c.l.s4 %v893_v4  ;;  %v77_v7 = vshrl.u32 %v76_v3, 7  ;;  %v30_v9 = vld [vmem:[%s1013_s0] sm:$0x1]  ;;  %v31_v10 = vld [vmem:[%s1013_s0 + $0x1] sm:$0x1]  ;;  %v821_v24 = vld [vmem:[#allocation2 + $0x70] sm:$0xff]  }
  0x11   :  { %724 = vmatpush3.bf16.msra.mxu0 %v812_v1  ;;  %v32_v11 = vld [vmem:[%s1013_s0 + $0x2] sm:$0x1]  ;;  %v33_v13 = vld [vmem:[%s1013_s0 + $0x3] sm:$0x1]  ;;  %v34_v14 = vld [vmem:[%s1013_s0 + $0x4] sm:$0x1]  ;;  %v69_v20 = vcombine.low %v30_v9, %v31_v10  ;;  %744 = vmatpush3.bf16.msra.mxu1 %v820_v18 }
  0x12   :  { %725 = vmatprep.subr.bf16.mxu0 %v891_v0  ;;  %v75_v12 = vunpack.c.0.s8 %v74_v5  ;;  %v35_v15 = vld [vmem:[%s1013_s0 + $0x5] sm:$0x1]  ;;  %v36_v16 = vld [vmem:[%s1013_s0 + $0x6] sm:$0x1]  ;;  %v37_v17 = vld [vmem:[%s1013_s0 + $0x7] sm:$0x1]  ;;  %v70_v21 = vcombine.low %v32_v11, %v33_v13  ;;  %745 = vmatprep.subr.bf16.mxu1 %v891_v0 }
  0x13   :  { %v71_v22 = vcombine.low %v34_v14, %v35_v15  ;;  %v72_v23 = vcombine.low %v36_v16, %v37_v17  ;;  %v816_v25 = vld [vmem:[#allocation2 + $0x18] sm:$0xff]   ;;  %v822_v26 = vld [vmem:[#allocation2 + $0x68] sm:$0xff]   ;;  %v817_v27 = vld [vmem:[#allocation2 + $0x10] sm:$0xff]  }
  0x14   :  { %v953_v19 = vsub.s32 %v75_v12, %v77_v7  ;;  %v823_v32 = vld [vmem:[#allocation2 + $0x60] sm:$0xff]   ;;  %v818_v33 = vld [vmem:[#allocation2 + $0x8] sm:$0xff]   ;;  %v824_v36 = vld [vmem:[#allocation2 + $0x58] sm:$0xff]  }
  0x15   :  { %726 = vmatpush3.bf16.msra.mxu0 %v813_v2  ;;  %746 = vmatpush3.bf16.msra.mxu1 %v821_v24  ;;  %v819_v37 = vld [vmem:[#allocation2] sm:$0xff]   ;;  %v825_v41 = vld [vmem:[#allocation2 + $0x50] sm:$0xff]   ;;  %v826_v42 = vld [vmem:[#allocation2 + $0x48] sm:$0xff]  }
  0x16   :  { %727 = vmatprep.subr.bf16.mxu0 %v891_v0  ;;  %v79_v28 = vrot.slane %v69_v20, %v953_v19  ;;  %v86_v29 = vrot.slane %v70_v21, %v953_v19  ;;  %v93_v30 = vrot.slane %v71_v22, %v953_v19  ;;  %v100_v31 = vrot.slane %v72_v23, %v953_v19  ;;  %v827_v43 = vld [vmem:[#allocation2 + $0x40] sm:$0xff]   ;;  %v828_v44 = vld [vmem:[#allocation2 + $0xb8] sm:$0xff]   ;;  %v829_v45 = vld [vmem:[#allocation2 + $0xb0] sm:$0xff]  }
  0x17   :  { %747 = vmatprep.subr.bf16.mxu1 %v891_v0  ;;  %v830_v46 = vld [vmem:[#allocation2 + $0xa8] sm:$0xff]   ;;  %v831_v47 = vld [vmem:[#allocation2 + $0xa0] sm:$0xff]   ;;  %v832_v48 = vld [vmem:[#allocation2 + $0x98] sm:$0xff]  }
  0x18   :  { %v101_v34 = vcombine.low %v79_v28, %v86_v29  ;;  %v102_v35 = vcombine.low %v93_v30, %v100_v31  ;;  %v643_v49 = vld [vmem:[%s1015_s2] ss:$0 sm:$0xff]  ;;  %v833_v59 = vld [vmem:[#allocation2 + $0x90] sm:$0xff]   ;;  %v834_v60 = vld [vmem:[#allocation2 + $0x88] sm:$0xff]  }
  0x19   :  { %728 = vmatpush3.bf16.msra.mxu0 %v814_v6  ;;  %748 = vmatpush3.bf16.msra.mxu1 %v822_v26  ;;  %v835_v61 = vld [vmem:[#allocation2 + $0x80] sm:$0xff]   ;;  %v836_v62 = vld [vmem:[#allocation2 + $0xf8] sm:$0xff]   ;;  %v837_v63 = vld [vmem:[#allocation2 + $0xf0] sm:$0xff]  }
  0x1a   :  { %729 = vmatprep.subr.bf16.mxu0 %v891_v0  ;;  %749 = vmatprep.subr.bf16.mxu1 %v891_v0  ;;  %v109_v38 = vrot.slane %v101_v34, %v953_v19  ;;  %v116_v39 = vrot.slane %v102_v35, %v953_v19  ;;  %v838_v1 = vld [vmem:[#allocation2 + $0xe8] sm:$0xff]   ;;  %v839_v2 = vld [vmem:[#allocation2 + $0xe0] sm:$0xff]   ;;  %v840_v3 = vld [vmem:[#allocation2 + $0xd8] sm:$0xff]  }
  0x1b   :  { %v653_v4 = vld [vmem:[%s1015_s2 + $0x1] ss:$0 sm:$0xff]  ;;  %v841_v14 = vld [vmem:[#allocation2 + $0xd0] sm:$0xff]   ;;  %v842_v15 = vld [vmem:[#allocation2 + $0xc8] sm:$0xff]  }
  0x1c   :  { %v117_v40 = vcombine.low %v109_v38, %v116_v39  ;;  %v843_v16 = vld [vmem:[#allocation2 + $0xc0] sm:$0xff]  }
  0x1d   :  { %730 = vmatpush3.bf16.msra.mxu0 %v815_v8  ;;  %750 = vmatpush3.bf16.msra.mxu1 %v823_v32  ;;  %v663_v17 = vld [vmem:[%s1015_s2 + $0x2] ss:$0 sm:$0xff] }
  0x1e   :  { %731 = vmatprep.subr.bf16.mxu0 %v891_v0  ;;  %751 = vmatprep.subr.bf16.mxu1 %v891_v0 }
  0x21   :  { %732 = vmatpush3.bf16.msra.mxu0 %v816_v25  ;;  %752 = vmatpush3.bf16.msra.mxu1 %v824_v36 }
  0x22   :  { %733 = vmatprep.subr.bf16.mxu0 %v891_v0  ;;  %753 = vmatprep.subr.bf16.mxu1 %v891_v0 }
  0x25   :  { %734 = vmatpush3.bf16.msra.mxu0 %v817_v27  ;;  %754 = vmatpush3.bf16.msra.mxu1 %v825_v41 }
  0x26   :  { %735 = vmatprep.subr.bf16.mxu0 %v891_v0  ;;  %755 = vmatprep.subr.bf16.mxu1 %v891_v0 }
  0x29   :  { %736 = vmatpush3.bf16.msra.mxu0 %v818_v33  ;;  %756 = vmatpush3.bf16.msra.mxu1 %v826_v42 }
  0x2a   :  { %737 = vmatprep.subr.bf16.mxu0 %v891_v0  ;;  %757 = vmatprep.subr.bf16.mxu1 %v891_v0 }
  0x2d   :  { %738 = vmatpush3.bf16.msra.mxu0 %v819_v37  ;;  %758 = vmatpush3.bf16.msra.mxu1 %v827_v43 }
  0x2e   :  { %763 = vmatprep.subr.bf16.mxu0 %v891_v0  ;;  %783 = vmatprep.subr.bf16.mxu1 %v891_v0 }
  0x30   :  { %740 = vmatmul.mubr.bf16.vlgmr.msra.gmra.mxu0 %v117_v40 }
  0x31   :  { %779 = vmatprep.mubr.msk.bf16.mxu0 %vm892_vm0, %v891_v0  ;;  %764 = vmatpush3.bf16.msra.mxu0 %v828_v44 }
  0x32   :  { %765 = vmatprep.subr.bf16.mxu0 %v891_v0 }
  0x35   :  { %766 = vmatpush3.bf16.msra.mxu0 %v829_v45 }
  0x36   :  { %767 = vmatprep.subr.bf16.mxu0 %v891_v0 }
  0x39   :  { %768 = vmatpush3.bf16.msra.mxu0 %v830_v46 }
  0x3a   :  { %769 = vmatprep.subr.bf16.mxu0 %v891_v0 }
  0x3d   :  { %770 = vmatpush3.bf16.msra.mxu0 %v831_v47 }
  0x3e   :  { %771 = vmatprep.subr.bf16.mxu0 %v891_v0 }
  0x41   :  { %772 = vmatpush3.bf16.msra.mxu0 %v832_v48 }
  0x42   :  { %773 = vmatprep.subr.bf16.mxu0 %v891_v0 }
  0x45   :  { %774 = vmatpush3.bf16.msra.mxu0 %v833_v59 }
  0x46   :  { %775 = vmatprep.subr.bf16.mxu0 %v891_v0 }
  0x49   :  { %776 = vmatpush3.bf16.msra.mxu0 %v834_v60 }
  0x4a   :  { %777 = vmatprep.subr.bf16.mxu0 %v891_v0 }
  0x4d   :  { %778 = vmatpush3.bf16.msra.mxu0 %v835_v61 }
  0xf0   :  { %v201_v50 = vpop.f32.mrf.mxu0 }
  0xf1   :  { %v202_v52 = vadd.f32 %v643_v49, %v201_v50 }
  0xf2   :  { %v741_v51 = vpop.f32.mrf.mxu0 }
  0xf3   :  { %v208_v56 = vmax.f32 %v202_v52, 0.0 }
  0xf4   :  { %v204_v53 = vpop.f32.mrf.mxu0 }
  0xf5   :  { %v205_v54 = vadd.f32 %v643_v49, %v204_v53 }
  0xf6   :  { %v742_v55 = vpop.f32.mrf.mxu0 }
  0xf7   :  { %v209_v57 = vmax.f32 %v205_v54, 0.0 }
  0xf9   :  { %v210_v58 = vpack.c.bf16 %v209_v57, %v208_v56 }
  0xfb   :  { %760 = vmatmul.mubr.bf16.vlgmr.msra.gmra.mxu1 %v210_v58 }
  0xfc   :  { %799 = vmatprep.mubr.msk.bf16.mxu1 %vm892_vm0, %v891_v0  ;;  %784 = vmatpush3.bf16.msra.mxu1 %v836_v62 }
  0xfd   :  { %785 = vmatprep.subr.bf16.mxu1 %v891_v0 }
 0x100   :  { %786 = vmatpush3.bf16.msra.mxu1 %v837_v63 }
 0x101   :  { %787 = vmatprep.subr.bf16.mxu1 %v891_v0 }
 0x104   :  { %788 = vmatpush3.bf16.msra.mxu1 %v838_v1 }
 0x105   :  { %789 = vmatprep.subr.bf16.mxu1 %v891_v0 }
 0x108   :  { %790 = vmatpush3.bf16.msra.mxu1 %v839_v2 }
 0x109   :  { %791 = vmatprep.subr.bf16.mxu1 %v891_v0 }
 0x10c   :  { %792 = vmatpush3.bf16.msra.mxu1 %v840_v3 }
 0x10d   :  { %793 = vmatprep.subr.bf16.mxu1 %v891_v0 }
 0x110   :  { %794 = vmatpush3.bf16.msra.mxu1 %v841_v14 }
 0x111   :  { %795 = vmatprep.subr.bf16.mxu1 %v891_v0 }
 0x114   :  { %796 = vmatpush3.bf16.msra.mxu1 %v842_v15 }
 0x115   :  { %797 = vmatprep.subr.bf16.mxu1 %v891_v0  ;;  %v673_v0 = vld [vmem:[%s1015_s2 + $0x3] ss:$0 sm:$0xff] }
 0x118   :  { %798 = vmatpush3.bf16.msra.mxu1 %v843_v16 }
 0x1bb   :  { %v318_v5 = vpop.f32.mrf.mxu1 }
 0x1bc   :  { %v319_v7 = vadd.f32 %v653_v4, %v318_v5 }
 0x1bd   :  { %v761_v6 = vpop.f32.mrf.mxu1 }
 0x1be   :  { %v325_v11 = vmax.f32 %v319_v7, 0.0 }
 0x1bf   :  { %v321_v8 = vpop.f32.mrf.mxu1 }
 0x1c0   :  { %v322_v9 = vadd.f32 %v653_v4, %v321_v8 }
 0x1c1   :  { %v762_v10 = vpop.f32.mrf.mxu1 }
 0x1c2   :  { %v326_v12 = vmax.f32 %v322_v9, 0.0 }
 0x1c4   :  { %v327_v13 = vpack.c.bf16 %v326_v12, %v325_v11 }
 0x1c6   :  { %780 = vmatmul.mubr.bf16.vlgmr.msra.gmra.mxu0 %v327_v13 }
 0x286   :  { %v435_v18 = vpop.f32.mrf.mxu0 }
 0x287   :  { %v436_v21 = vadd.f32 %v663_v17, %v435_v18 }
 0x288   :  { %v781_v20 = vpop.f32.mrf.mxu0 }
 0x289   :  { %v442_v25 = vmax.f32 %v436_v21, 0.0 }
 0x28a   :  { %v438_v22 = vpop.f32.mrf.mxu0 }
 0x28b   :  { %v439_v23 = vadd.f32 %v663_v17, %v438_v22 }
 0x28c   :  { %v782_v24 = vpop.f32.mrf.mxu0 }
 0x28d   :  { %v443_v26 = vmax.f32 %v439_v23, 0.0 }
 0x28f   :  { %v444_v27 = vpack.c.bf16 %v443_v26, %v442_v25 }
 0x291   :  { %800 = vmatmul.mubr.bf16.vlgmr.msra.gmra.mxu1 %v444_v27 }
 0x351   :  { %v552_v28 = vpop.f32.mrf.mxu1 }
 0x352   :  { %v553_v31 = vadd.f32 %v673_v0, %v552_v28 }
 0x353   :  { %v801_v29 = vpop.f32.mrf.mxu1 }
 0x355   :  { %v555_v30 = vpop.f32.mrf.mxu1 }
 0x356   :  { %v556_v32 = vadd.f32 %v673_v0, %v555_v30 }
 0x357   :  { %v802_v33 = vpop.f32.mrf.mxu1 }
 0x358   :  { %v559_v34 = vpack.c.bf16 %v556_v32, %v553_v31  ;;  %v682_v35 = vpack.c.bf16 %v556_v32, %v556_v32 }
 0x35a   :  { %v568_v36 = vrot.slane %v559_v34, %v953_v19  ;;  %v575_v37 = vrot.slane %v682_v35, %v953_v19 }
 0x35c   :  { %v576_v38 = vcombine.high %v568_v36, %v568_v36  ;;  %v577_v39 = vcombine.high %v575_v37, %v575_v37  ;;  %v584_v40 = vrot.slane %v568_v36, %v953_v19  ;;  %v591_v41 = vrot.slane %v575_v37, %v953_v19  ;;  %683 = vst.sshfl [vmem:[#allocation5] sm:$0x1 pattern:$0x73625140] %v568_v36 }
 0x35d   :  { %685 = vst.sshfl [vmem:[#allocation5 + $0x4] sm:$0x1 pattern:$0x73625140] %v575_v37 }
 0x35e   :  { %v598_v42 = vrot.slane %v576_v38, %v953_v19  ;;  %v605_v43 = vrot.slane %v577_v39, %v953_v19  ;;  %v606_v44 = vcombine.high %v584_v40, %v584_v40  ;;  %v607_v45 = vcombine.high %v591_v41, %v591_v41  ;;  %684 = vst.sshfl [vmem:[#allocation5 + $0x1] sm:$0x1 pattern:$0x73625140] %v576_v38 }
 0x35f   :  { %686 = vst.sshfl [vmem:[#allocation5 + $0x5] sm:$0x1 pattern:$0x73625140] %v577_v39 }
 0x360   :  { %v608_v46 = vcombine.high %v598_v42, %v598_v42  ;;  %v609_v47 = vcombine.high %v605_v43, %v605_v43  ;;  %620 = vst [vmem:[#allocation5 + $0x2] sm:$0x1] %v606_v44  ;;  %624 = vst [vmem:[#allocation5 + $0x6] sm:$0x1] %v607_v45 }
 0x362   :  { %621 = vst [vmem:[#allocation5 + $0x3] sm:$0x1] %v608_v46  ;;  %625 = vst [vmem:[#allocation5 + $0x7] sm:$0x1] %v609_v47 }
 0x363   :  { %630 = vsyncadd [#allocation4], 112  ;;  %s894_s2 = smov [#allocation5]  }
 0x364   :  { %s631_s14 = sshll.u32 %s894_s2, 4  ;;  %s632_s14 = int_to_ptr.vmem [resolvable:$true] %s631_s14 }
 0x365   :  { %s864_s15 = scalar_lea.vmem %s632_s14, 16  ;;  %s868_s16 = scalar_lea.vmem %s632_s14, 128 }
 0x366   :  { %p865_p5 = scmp.ne.s32.totalorder %s632_s14, %s864_s15  ;;  %p869_p6 = scmp.lt.s32.totalorder %s632_s14, %s632_s14 }
 0x367   :  { %p870_p7 = scmp.lt.s32.totalorder %s868_s16, %s864_s15 }
 0x369   :  { %p871_p8 = por %p870_p7, %p869_p6 }
 0x36b   :  { %p872_p9 = pnand %p871_p8, %p865_p5 }
 0x36d   :  { %875 = shalt.err (!%p872_p9)
}
 0x36e   :  { %s895_s17 = smov 16   ;;  %s896_s18 = smov 1  }
 0x36f   :  { %637 = dma.vmem_to_hbm [thread:$0]  %s632_s14, 16, %s1016_s3, [#allocation4], %s895_s17, %s895_s17, %s896_s18  }
 0x370   :  { %886 = dma.done.wait [#allocation4], 128  }
 0x371   :  { %887 = vsyncadd [#allocation4], 4294967168 }
 0x372   :  { %641 = vsyncpa [#allocation3], 1 }
 0x373   :  { %642 = vsyncpa [#allocation4], 1 }

</bundles_post_ra>
